<compile_context>
chip_gen: v5e
topology: v5e:2x2
jax: 0.10.0
libtpu: 0.0.40
codegen_flags: <defaults>
</compile_context>

<pallas_src>
import math
from functools import partial

import jax
import jax.numpy as jnp
from jax import lax
from jax.experimental import pallas as pl
from jax.experimental.pallas import tpu as pltpu

LANE = 128      # TPU lane width (last-dim tile)
SUBLANE = 8     # f32 sublane width (second-to-last-dim tile)
TM_MAX = 2048   # batch tile; big tiles amortize the ~0.35us per-grid-step overhead


def _round_up(x, m):
    return ((x + m - 1) // m) * m


def _cdiv(a, b):
    return (a + b - 1) // b


_VMEM_LIMIT = None


def _vmem_limit_bytes():
    """Chip-aware scoped-VMEM budget: <= 3/4 of physical VMEM, capped at 100 MiB.

    v5e/v6e (128 MiB physical) -> 96 MiB; v7x (64 MiB physical) -> 48 MiB.
    """
    global _VMEM_LIMIT
    if _VMEM_LIMIT is None:
        try:
            cap = int(pltpu.get_tpu_info().vmem_capacity_bytes)
        except Exception:
            cap = 64 * 1024 * 1024  # conservative fallback (v7x-sized)
        _VMEM_LIMIT = min((cap * 3) // 4, 100 * 1024 * 1024)
    return _VMEM_LIMIT


# ---------------------------------------------------------------------------------
# Kernels
# ---------------------------------------------------------------------------------

def _mlp_q_values(x_ref, w1_ref, b1_ref, w2_ref, b2_ref, w3_ref, b3_ref):
    """Fused fc1->ReLU->fc2->ReLU->fc3 on one batch tile. Returns f32 (TM, act_p)."""
    # In-kernel cast of the batch tile to the weights' compute dtype (bf16 default);
    # avoids a separate wrapper-side astype pass over x in HBM.
    x = x_ref[...].astype(w1_ref.dtype)
    h1 = jnp.dot(x, w1_ref[...], preferred_element_type=jnp.float32)
    h1 = jnp.maximum(h1 + b1_ref[...], 0.0)          # f32 epilogue (v5e-safe)
    h2 = jnp.dot(h1.astype(w2_ref.dtype), w2_ref[...],
                 preferred_element_type=jnp.float32)
    h2 = jnp.maximum(h2 + b2_ref[...], 0.0)
    q = jnp.dot(h2.astype(w3_ref.dtype), w3_ref[...],
                preferred_element_type=jnp.float32)
    return q + b3_ref[...]


def qnetwork_kernel(x_ref, w1_ref, b1_ref, w2_ref, b2_ref, w3_ref, b3_ref, out_ref):
    """Q-value forward: lane-dense (TM, act_p) store in out_ref.dtype (bf16 default)."""
    q = _mlp_q_values(x_ref, w1_ref, b1_ref, w2_ref, b2_ref, w3_ref, b3_ref)
    out_ref[...] = q.astype(out_ref.dtype)


def qnetwork_argmax_kernel(x_ref, w1_ref, b1_ref, w2_ref, b2_ref, w3_ref, b3_ref,
                           act_ref, *, act_size):
    """act() path: fused greedy argmax -> one int32 per row (no padded Q writeback)."""
    q = _mlp_q_values(x_ref, w1_ref, b1_ref, w2_ref, b2_ref, w3_ref, b3_ref)
    col = lax.broadcasted_iota(jnp.int32, q.shape, 1)
    qm = jnp.where(col < act_size, q, -jnp.inf)       # mask padded lanes
    qmax = jnp.max(qm, axis=-1, keepdims=True)
    # First index achieving the max (matches torch .max(1)[1] / jnp.argmax).
    hit = jnp.where(qm == qmax, col.astype(jnp.float32), float(q.shape[-1]))
    act_ref[...] = jnp.min(hit, axis=-1, keepdims=True).astype(jnp.int32)


# ---------------------------------------------------------------------------------
# Parameter preparation (call once, outside any loop)
# ---------------------------------------------------------------------------------

def prepare_qnetwork_params(params, compute_dtype=jnp.bfloat16):
    """Zero-pad hidden/output feature dims to the 128-lane width and cast the matmul
    operands to the compute dtype (bf16 by default; f32 is the debug path). Zero
    padding keeps the math identical (padded hidden units stay exactly 0 through
    ReLU). Biases stay f32."""
    # NOTE(v6e/v7x): if hidden_size is tunable, multiples of 256 fill the 2x256x256
    # MXU once the kernel is no longer write-bound.
    w1, b1, w2, b2, w3, b3 = params
    obs, hid = w1.shape
    act = w3.shape[1]
    hid_p = _round_up(hid, LANE)
    act_p = _round_up(act, LANE)

    def pad2(a, rows, cols):
        return jnp.pad(a, ((0, rows - a.shape[0]), (0, cols - a.shape[1])))

    w1p = pad2(w1, obs, hid_p).astype(compute_dtype)
    b1p = pad2(b1, 1, hid_p).astype(jnp.float32)
    w2p = pad2(w2, hid_p, hid_p).astype(compute_dtype)
    b2p = pad2(b2, 1, hid_p).astype(jnp.float32)
    w3p = pad2(w3, hid_p, act_p).astype(compute_dtype)
    b3p = pad2(b3, 1, act_p).astype(jnp.float32)
    return (w1p, b1p, w2p, b2p, w3p, b3p)


# ---------------------------------------------------------------------------------
# Wrappers
# ---------------------------------------------------------------------------------

def _batch_tiling(batch, tm):
    """Balanced batch tiling: minimal padding waste, and >=2 grid steps whenever the
    batch allows so the 'parallel' axis can shard across both v7x TensorCores."""
    n_tiles = _cdiv(batch, tm)
    if batch >= 2 * SUBLANE:
        n_tiles = max(n_tiles, 2)
    tm_eff = _round_up(_cdiv(batch, n_tiles), SUBLANE)
    return tm_eff, _cdiv(batch, tm_eff)


def _in_specs(tm_eff, obs, padded_params):
    specs = [pl.BlockSpec((tm_eff, obs), lambda i: (i, 0))]   # x: tiled over batch
    for p in padded_params:
        # Weights/biases: same block every grid step -> VMEM-resident, no re-DMA.
        # TODO(synk): for very large hidden_size, single-buffer these
        # (pipeline_mode=pl.Buffered(1)) or tile w2/w3 over a hidden grid axis so the
        # footprint fits v7x's 64 MiB VMEM; at typical Q-network sizes it is tiny.
        specs.append(pl.BlockSpec(p.shape, lambda i: (0, 0)))
    return specs


@partial(jax.jit, static_argnames=("act_size", "out_dtype", "tm", "trim"))
def qnetwork_forward(x, padded_params, act_size, *, out_dtype=jnp.bfloat16,
                     tm=TM_MAX, trim=True):
    """Fused MLP forward: one pallas_call gridded over the batch dimension.

    Returns (batch, act_size) by default; pass trim=False to get the padded
    lane-dense (batch, act_p) output and skip the extra slice pass entirely."""
    w1, b1, w2, b2, w3, b3 = padded_params
    batch, obs = x.shape
    act_p = w3.shape[1]
    tm_eff, n_steps = _batch_tiling(batch, tm)

    out = pl.pallas_call(
        qnetwork_kernel,
        out_shape=jax.ShapeDtypeStruct((batch, act_p), out_dtype),
        grid_spec=pltpu.PrefetchScalarGridSpec(
            num_scalar_prefetch=0,
            grid=(n_steps,),
            in_specs=_in_specs(tm_eff, obs, padded_params),
            out_specs=pl.BlockSpec((tm_eff, act_p), lambda i: (i, 0)),
        ),
        compiler_params=pltpu.CompilerParams(
            dimension_semantics=("parallel",),      # megacore-shardable batch axis
            vmem_limit_bytes=_vmem_limit_bytes(),
        ),
    )(x, w1, b1, w2, b2, w3, b3)

    return out[:, :act_size] if trim else out


@partial(jax.jit, static_argnames=("act_size", "tm"))
def qnetwork_act(x, padded_params, act_size, *, tm=TM_MAX):
    """Greedy-action path (QNetwork.act without the epsilon branch): fused argmax,
    writes one int32 action index per row instead of a padded Q tensor."""
    # TODO(synk): epsilon-greedy exploration (random.random() branch) is host-side
    # control flow in the original module; only the greedy argmax is fused here.
    w1, b1, w2, b2, w3, b3 = padded_params
    batch, obs = x.shape
    tm_eff, n_steps = _batch_tiling(batch, tm)

    actions = pl.pallas_call(
        partial(qnetwork_argmax_kernel, act_size=act_size),
        out_shape=jax.ShapeDtypeStruct((batch, 1), jnp.int32),
        grid_spec=pltpu.PrefetchScalarGridSpec(
            num_scalar_prefetch=0,
            grid=(n_steps,),
            in_specs=_in_specs(tm_eff, obs, padded_params),
            out_specs=pl.BlockSpec((tm_eff, 1), lambda i: (i, 0)),
        ),
        compiler_params=pltpu.CompilerParams(
            dimension_semantics=("parallel",),
            vmem_limit_bytes=_vmem_limit_bytes(),
        ),
    )(x, w1, b1, w2, b2, w3, b3)
    return actions[:, 0]


# ---------------------------------------------------------------------------------
# Init + reference
# ---------------------------------------------------------------------------------

def init_qnetwork_params(key, obs_size, act_size, hidden_size):
    """Deterministic init mimicking PyTorch nn.Linear: U(-1/sqrt(fan_in), 1/sqrt(fan_in))."""
    keys = jax.random.split(key, 6)

    def linear(kw, kb, fan_in, fan_out):
        bound = 1.0 / math.sqrt(fan_in)
        w = jax.random.uniform(kw, (fan_in, fan_out), jnp.float32, -bound, bound)
        b = jax.random.uniform(kb, (1, fan_out), jnp.float32, -bound, bound)
        return w, b

    w1, b1 = linear(keys[0], keys[1], obs_size, hidden_size)
    w2, b2 = linear(keys[2], keys[3], hidden_size, hidden_size)
    w3, b3 = linear(keys[4], keys[5], hidden_size, act_size)
    return (w1, b1, w2, b2, w3, b3)


def qnetwork_reference(x, params):
    """Plain-JAX reference for correctness checks."""
    w1, b1, w2, b2, w3, b3 = params
    h1 = jnp.maximum(x @ w1 + b1, 0.0)
    h2 = jnp.maximum(h1 @ w2 + b2, 0.0)
    return h2 @ w3 + b3


if __name__ == "__main__":
    obs_size, act_size, hidden_size = 8, 4, 32

    key = jax.random.PRNGKey(0)
    k_x, k_x2, k_p = jax.random.split(key, 3)

    params = init_qnetwork_params(k_p, obs_size, act_size, hidden_size)

    # ---- small batch (pure correctness smoke test; the kernel targets large RL batches)
    x = jax.random.normal(k_x, (2, obs_size), dtype=jnp.float32)
    ref = qnetwork_reference(x, params)

    # Opt-in f32 debug path: strict correctness.
    padded_f32 = prepare_qnetwork_params(params, jnp.float32)
    out_f32 = jax.block_until_ready(
        qnetwork_forward(x, padded_f32, act_size=act_size, out_dtype=jnp.float32))
    assert out_f32.shape == (2, act_size)
    assert jnp.allclose(out_f32, ref, atol=1e-5, rtol=1e-5)

    # Default path: bf16 matmul operands + bf16 lane-dense output, f32 accumulation.
    padded_bf16 = prepare_qnetwork_params(params)
    out_bf16 = jax.block_until_ready(
        qnetwork_forward(x, padded_bf16, act_size=act_size))
    assert out_bf16.dtype == jnp.bfloat16
    assert jnp.allclose(out_bf16.astype(jnp.float32), ref, atol=1e-1, rtol=1e-1)

    # act() path: fused greedy argmax (f32 params for an exact index match).
    actions = jax.block_until_ready(qnetwork_act(x, padded_f32, act_size=act_size))
    assert actions.shape == (2,)
    assert bool(jnp.all(actions == jnp.argmax(ref, axis=-1)))

    # Ragged multi-tile batch: exercises >=2 grid steps and the masked edge tile.
    x2 = jax.random.normal(k_x2, (37, obs_size), dtype=jnp.float32)
    ref2 = qnetwork_reference(x2, params)
    out2 = jax.block_until_ready(
        qnetwork_forward(x2, padded_bf16, act_size=act_size))
    assert out2.shape == (37, act_size)
    assert jnp.allclose(out2.astype(jnp.float32), ref2, atol=1e-1, rtol=1e-1)

    print("KERNEL_OK")
</pallas_src>

<mosaic_0001>
module attributes {stable_mosaic.version = 11 : i64} {
  func.func @qnetwork_kernel(%arg0: i32, %arg1: memref<8x8xf32, #tpu.memory_space<vmem>>, %arg2: memref<8x128xf32, #tpu.memory_space<vmem>>, %arg3: memref<1x128xf32, #tpu.memory_space<vmem>>, %arg4: memref<128x128xf32, #tpu.memory_space<vmem>>, %arg5: memref<1x128xf32, #tpu.memory_space<vmem>>, %arg6: memref<128x128xf32, #tpu.memory_space<vmem>>, %arg7: memref<1x128xf32, #tpu.memory_space<vmem>>, %arg8: memref<8x128xf32, #tpu.memory_space<vmem>>) attributes {dimension_semantics = [#tpu.dimension_semantics<parallel>], iteration_bounds = array<i64: 1>, scalar_prefetch = 0 : i64, scratch_operands = 0 : i64, tpu.core_type = #tpu.core_type<tc>, window_params = [{transform_indices = @transform_0, window_bounds = array<i64: 8, 8>}, {pipeline_mode = #tpu.pipeline_mode<synchronous>, transform_indices = @transform_1, window_bounds = array<i64: 8, 128>}, {pipeline_mode = #tpu.pipeline_mode<synchronous>, transform_indices = @transform_2, window_bounds = array<i64: 1, 128>}, {pipeline_mode = #tpu.pipeline_mode<synchronous>, transform_indices = @transform_3, window_bounds = array<i64: 128, 128>}, {pipeline_mode = #tpu.pipeline_mode<synchronous>, transform_indices = @transform_4, window_bounds = array<i64: 1, 128>}, {pipeline_mode = #tpu.pipeline_mode<synchronous>, transform_indices = @transform_5, window_bounds = array<i64: 128, 128>}, {pipeline_mode = #tpu.pipeline_mode<synchronous>, transform_indices = @transform_6, window_bounds = array<i64: 1, 128>}, {transform_indices = @transform_7, window_bounds = array<i64: 8, 128>}]} {
    %c0 = arith.constant 0 : index
    %c0_0 = arith.constant 0 : index
    %0 = vector.load %arg1[%c0, %c0_0] : memref<8x8xf32, #tpu.memory_space<vmem>>, vector<8x8xf32>
    %c0_1 = arith.constant 0 : index
    %c0_2 = arith.constant 0 : index
    %1 = vector.load %arg2[%c0_1, %c0_2] : memref<8x128xf32, #tpu.memory_space<vmem>>, vector<8x128xf32>
    %cst = arith.constant dense<0.000000e+00> : vector<8x128xf32>
    %2 = tpu.matmul %0, %1, %cst {dimension_numbers = #tpu.dot_dimension_numbers<[1], [0], [0], [1], [0, 0, 1, 1], [], []>} : vector<8x8xf32>, vector<8x128xf32>, vector<8x128xf32> -> vector<8x128xf32>
    %c0_3 = arith.constant 0 : index
    %c0_4 = arith.constant 0 : index
    %3 = vector.load %arg3[%c0_3, %c0_4] : memref<1x128xf32, #tpu.memory_space<vmem>>, vector<1x128xf32>
    %4 = vector.broadcast %3 : vector<1x128xf32> to vector<8x128xf32>
    %5 = arith.addf %2, %4 : vector<8x128xf32>
    %cst_5 = arith.constant 0.000000e+00 : f32
    %6 = vector.broadcast %cst_5 : f32 to vector<8x128xf32>
    %7 = arith.maximumf %5, %6 : vector<8x128xf32>
    %c0_6 = arith.constant 0 : index
    %c0_7 = arith.constant 0 : index
    %8 = vector.load %arg4[%c0_6, %c0_7] : memref<128x128xf32, #tpu.memory_space<vmem>>, vector<128x128xf32>
    %cst_8 = arith.constant dense<0.000000e+00> : vector<8x128xf32>
    %9 = tpu.matmul %7, %8, %cst_8 {dimension_numbers = #tpu.dot_dimension_numbers<[1], [0], [0], [1], [0, 0, 1, 1], [], []>} : vector<8x128xf32>, vector<128x128xf32>, vector<8x128xf32> -> vector<8x128xf32>
    %c0_9 = arith.constant 0 : index
    %c0_10 = arith.constant 0 : index
    %10 = vector.load %arg5[%c0_9, %c0_10] : memref<1x128xf32, #tpu.memory_space<vmem>>, vector<1x128xf32>
    %11 = vector.broadcast %10 : vector<1x128xf32> to vector<8x128xf32>
    %12 = arith.addf %9, %11 : vector<8x128xf32>
    %cst_11 = arith.constant 0.000000e+00 : f32
    %13 = vector.broadcast %cst_11 : f32 to vector<8x128xf32>
    %14 = arith.maximumf %12, %13 : vector<8x128xf32>
    %c0_12 = arith.constant 0 : index
    %c0_13 = arith.constant 0 : index
    %15 = vector.load %arg6[%c0_12, %c0_13] : memref<128x128xf32, #tpu.memory_space<vmem>>, vector<128x128xf32>
    %cst_14 = arith.constant dense<0.000000e+00> : vector<8x128xf32>
    %16 = tpu.matmul %14, %15, %cst_14 {dimension_numbers = #tpu.dot_dimension_numbers<[1], [0], [0], [1], [0, 0, 1, 1], [], []>} : vector<8x128xf32>, vector<128x128xf32>, vector<8x128xf32> -> vector<8x128xf32>
    %c0_15 = arith.constant 0 : index
    %c0_16 = arith.constant 0 : index
    %17 = vector.load %arg7[%c0_15, %c0_16] : memref<1x128xf32, #tpu.memory_space<vmem>>, vector<1x128xf32>
    %18 = vector.broadcast %17 : vector<1x128xf32> to vector<8x128xf32>
    %19 = arith.addf %16, %18 : vector<8x128xf32>
    %c0_17 = arith.constant 0 : index
    %c0_18 = arith.constant 0 : index
    %20 = vector.load %arg8[%c0_17, %c0_18] : memref<8x128xf32, #tpu.memory_space<vmem>>, vector<8x128xf32>
    tpu.vector_store %arg8[%c0_17, %c0_18], %19 {strides = array<i32>} : memref<8x128xf32, #tpu.memory_space<vmem>>, vector<8x128xf32>,
    return
  }
  func.func @transform_0(%arg0: i32) -> (i32, i32) {
    %c0_i32 = arith.constant 0 : i32
    %c0_i32_0 = arith.constant 0 : i32
    return %arg0, %c0_i32 : i32, i32
  }
  func.func @transform_1(%arg0: i32) -> (i32, i32) {
    %c0_i32 = arith.constant 0 : i32
    %c0_i32_0 = arith.constant 0 : i32
    %c0_i32_1 = arith.constant 0 : i32
    return %c0_i32, %c0_i32_0 : i32, i32
  }
  func.func @transform_2(%arg0: i32) -> (i32, i32) {
    %c0_i32 = arith.constant 0 : i32
    %c0_i32_0 = arith.constant 0 : i32
    %c0_i32_1 = arith.constant 0 : i32
    return %c0_i32, %c0_i32_0 : i32, i32
  }
  func.func @transform_3(%arg0: i32) -> (i32, i32) {
    %c0_i32 = arith.constant 0 : i32
    %c0_i32_0 = arith.constant 0 : i32
    %c0_i32_1 = arith.constant 0 : i32
    return %c0_i32, %c0_i32_0 : i32, i32
  }
  func.func @transform_4(%arg0: i32) -> (i32, i32) {
    %c0_i32 = arith.constant 0 : i32
    %c0_i32_0 = arith.constant 0 : i32
    %c0_i32_1 = arith.constant 0 : i32
    return %c0_i32, %c0_i32_0 : i32, i32
  }
  func.func @transform_5(%arg0: i32) -> (i32, i32) {
    %c0_i32 = arith.constant 0 : i32
    %c0_i32_0 = arith.constant 0 : i32
    %c0_i32_1 = arith.constant 0 : i32
    return %c0_i32, %c0_i32_0 : i32, i32
  }
  func.func @transform_6(%arg0: i32) -> (i32, i32) {
    %c0_i32 = arith.constant 0 : i32
    %c0_i32_0 = arith.constant 0 : i32
    %c0_i32_1 = arith.constant 0 : i32
    return %c0_i32, %c0_i32_0 : i32, i32
  }
  func.func @transform_7(%arg0: i32) -> (i32, i32) {
    %c0_i32 = arith.constant 0 : i32
    %c0_i32_0 = arith.constant 0 : i32
    return %arg0, %c0_i32 : i32, i32
  }
}

</mosaic_0001>

<bundles_post_ra>
// kernel: qnetwork_forward.1
= control target key start
LH: loop header
LB: loop body
LE: loop exit
PB: predicated region body
PF: predicated region fallthrough
CT: control target
= control target key end

     0   :  { %12 = vsyncpa [#allocation3], 0  ;;  %s442_s0 = inlined_call_operand.hbm [shape: f32[2,8], index: 0, kind: input, shape index: {}]   ;;  %s443_s1 = inlined_call_operand.hbm [shape: f32[8,128], index: 1, kind: input, shape index: {}]   ;;  %s444_s2 = inlined_call_operand.vmem [shape: f32[1,128], index: 2, kind: input, shape index: {}]   ;;  %s445_s3 = inlined_call_operand.hbm [shape: f32[128,128], index: 3, kind: input, shape index: {}]   ;;  %s446_s4 = inlined_call_operand.vmem [shape: f32[1,128], index: 4, kind: input, shape index: {}]   ;;  %s447_s5 = inlined_call_operand.hbm [shape: f32[128,128], index: 5, kind: input, shape index: {}]   ;;  %s448_s6 = inlined_call_operand.vmem [shape: f32[1,128], index: 6, kind: input, shape index: {}]   ;;  %s449_s7 = inlined_call_operand.hbm [shape: f32[2,128], index: 7, kind: output, shape index: {}]  }
   0x1   :  { %13 = vsyncpa [#allocation6], 0 }
   0x2   :  { %14 = vsyncpa [#allocation9], 0 }
   0x3   :  { %15 = vsyncpa [#allocation4], 0  ;;  %s34_s26 = sshll.u32 %s443_s1, 4  ;;  %s35_s26 = int_to_ptr.hbm [resolvable:$true] %s34_s26 }
   0x4   :  { %19 = vsyncadd [#allocation3], 96  ;;  %s363_s27 = smov [#allocation5]   ;;  %s20_s8 = sshll.u32 %s442_s0, 4  ;;  %s21_s8 = int_to_ptr.hbm [resolvable:$true] %s20_s8 }
   0x5   :  { %s36_s28 = sshll.u32 %s363_s27, 4  ;;  %s364_s9 = smov [#allocation2]   ;;  %s37_s28 = int_to_ptr.vmem [resolvable:$true] %s36_s28 }
   0x6   :  { %39 = dma.hbm_to_vmem [thread:$0]  %s35_s26, 128, %s37_s28, [#allocation6]  }
   0x7   :  { %s22_s10 = sshll.u32 %s364_s9, 4  ;;  %s365_s11 = smov 32   ;;  %s23_s10 = int_to_ptr.vmem [resolvable:$true] %s22_s10 }
   0x8   :  { %s366_s12 = smov 2   ;;  %s46_s14 = sshll.u32 %s445_s3, 4  ;;  %s47_s14 = int_to_ptr.hbm [resolvable:$true] %s46_s14 }
   0x9   :  { %28 = dma.hbm_to_vmem [thread:$0]  %s21_s8, 32, %s23_s10, [#allocation3], %s365_s11, %s365_s11, %s366_s12  }
   0xa   :  { %s367_s15 = smov [#allocation7]   ;;  %s61_s18 = sshll.u32 %s447_s5, 4  ;;  %s62_s18 = int_to_ptr.hbm [resolvable:$true] %s61_s18 }
   0xb   :  { %s48_s16 = sshll.u32 %s367_s15, 4  ;;  %s368_s19 = smov 128   ;;  %s49_s16 = int_to_ptr.vmem [resolvable:$true] %s48_s16 }
   0xc   :  { %s369_s20 = smov 8   ;;  %s370_s21 = smov [#allocation8]  }
   0xd   :  { %54 = dma.hbm_to_vmem [thread:$0]  %s47_s14, 2048, %s49_s16, [#allocation6], %s368_s19, %s368_s19, %s369_s20  }
   0xe   :  { %s63_s22 = sshll.u32 %s370_s21, 4  ;;  %s64_s22 = int_to_ptr.vmem [resolvable:$true] %s63_s22 }
   0xf   :  { %69 = dma.hbm_to_vmem [thread:$0]  %s62_s18, 2048, %s64_s22, [#allocation9], %s368_s19, %s368_s19, %s369_s20  }
  0x10   :  { %355 = dma.done.wait [#allocation3], 128  }
  0x11   :  { %356 = vsyncadd [#allocation3], 4294967168 }
  0x12   :  { %357 = dma.done.wait [#allocation6], 2176  }
  0x13   :  { %358 = vsyncadd [#allocation6], 4294965120 }
  0x14   :  { %359 = dma.done.wait [#allocation9], 2048  }
  0x15   :  { %360 = vsyncadd [#allocation9], 4294965248  ;;  %vm94_vm0 = vcmask 64512   ;;  %v89_v0 = vld [vmem:[#allocation5] sm:$0xff]  ;;  %v88_v1 = vld [vmem:[#allocation2] sm:$0xff] }
  0x16   :  { %v134_v2 = vld [vmem:[#allocation7 + $0x78] sm:$0xff]  ;;  %113 = vmatpush.msra.mxu0 %v89_v0  ;;  %v133_v3 = vld [vmem:[#allocation7 + $0x70] sm:$0xff]  ;;  %v132_v4 = vld [vmem:[#allocation7 + $0x68] sm:$0xff] }
  0x17   :  { %139 = vmatpush.msra.mxu1 %v134_v2  ;;  %222 = vmatmul.msk.f32.vlgmr.msra.gmra.mxu0 %vm94_vm0, %v88_v1  ;;  %v131_v5 = vld [vmem:[#allocation7 + $0x60] sm:$0xff]  ;;  %v130_v6 = vld [vmem:[#allocation7 + $0x58] sm:$0xff]  ;;  %v129_v7 = vld [vmem:[#allocation7 + $0x50] sm:$0xff] }
  0x18   :  { %v128_v8 = vld [vmem:[#allocation7 + $0x48] sm:$0xff]  ;;  %v127_v9 = vld [vmem:[#allocation7 + $0x40] sm:$0xff]  ;;  %v126_v10 = vld [vmem:[#allocation7 + $0x38] sm:$0xff] }
  0x19   :  { %140 = vmatpush.msra.mxu1 %v133_v3  ;;  %v125_v11 = vld [vmem:[#allocation7 + $0x30] sm:$0xff]  ;;  %v124_v12 = vld [vmem:[#allocation7 + $0x28] sm:$0xff]  ;;  %v123_v13 = vld [vmem:[#allocation7 + $0x20] sm:$0xff] }
  0x1a   :  { %v122_v14 = vld [vmem:[#allocation7 + $0x18] sm:$0xff]  ;;  %v121_v15 = vld [vmem:[#allocation7 + $0x10] sm:$0xff]  ;;  %v120_v16 = vld [vmem:[#allocation7 + $0x8] sm:$0xff] }
  0x1b   :  { %141 = vmatpush.msra.mxu1 %v132_v4  ;;  %v119_v17 = vld [vmem:[#allocation7] sm:$0xff]  ;;  %v175_v18 = vld [vmem:[#allocation8 + $0x78] sm:$0xff]  ;;  %v174_v19 = vld [vmem:[#allocation8 + $0x70] sm:$0xff] }
  0x1c   :  { %180 = vmatpush.msra.mxu2 %v175_v18  ;;  %v173_v20 = vld [vmem:[#allocation8 + $0x68] sm:$0xff]  ;;  %v172_v21 = vld [vmem:[#allocation8 + $0x60] sm:$0xff]  ;;  %v171_v22 = vld [vmem:[#allocation8 + $0x58] sm:$0xff] }
  0x1d   :  { %142 = vmatpush.msra.mxu1 %v131_v5  ;;  %v170_v23 = vld [vmem:[#allocation8 + $0x50] sm:$0xff]  ;;  %v169_v24 = vld [vmem:[#allocation8 + $0x48] sm:$0xff]  ;;  %v168_v25 = vld [vmem:[#allocation8 + $0x40] sm:$0xff] }
  0x1e   :  { %181 = vmatpush.msra.mxu2 %v174_v19  ;;  %v167_v26 = vld [vmem:[#allocation8 + $0x38] sm:$0xff]  ;;  %v166_v27 = vld [vmem:[#allocation8 + $0x30] sm:$0xff]  ;;  %v165_v28 = vld [vmem:[#allocation8 + $0x28] sm:$0xff] }
  0x1f   :  { %143 = vmatpush.msra.mxu1 %v130_v6  ;;  %v164_v29 = vld [vmem:[#allocation8 + $0x20] sm:$0xff]  ;;  %v163_v30 = vld [vmem:[#allocation8 + $0x18] sm:$0xff]  ;;  %v232_v31 = vld [vmem:[%s444_s2] ss:$0 sm:$0xff] }
  0x20   :  { %182 = vmatpush.msra.mxu2 %v173_v20  ;;  %v162_v35 = vld [vmem:[#allocation8 + $0x10] sm:$0xff]  ;;  %v161_v36 = vld [vmem:[#allocation8 + $0x8] sm:$0xff]  ;;  %v160_v37 = vld [vmem:[#allocation8] sm:$0xff] }
  0x21   :  { %144 = vmatpush.msra.mxu1 %v129_v7  ;;  %v233_v38 = vld [vmem:[%s446_s4] ss:$0 sm:$0xff] }
  0x22   :  { %183 = vmatpush.msra.mxu2 %v172_v21  ;;  %v234_v42 = vld [vmem:[%s448_s6] ss:$0 sm:$0xff] }
  0x23   :  { %145 = vmatpush.msra.mxu1 %v128_v8 }
  0x24   :  { %184 = vmatpush.msra.mxu2 %v171_v22 }
  0x25   :  { %146 = vmatpush.msra.mxu1 %v127_v9 }
  0x26   :  { %185 = vmatpush.msra.mxu2 %v170_v23 }
  0x27   :  { %147 = vmatpush.msra.mxu1 %v126_v10 }
  0x28   :  { %186 = vmatpush.msra.mxu2 %v169_v24 }
  0x29   :  { %148 = vmatpush.msra.mxu1 %v125_v11 }
  0x2a   :  { %187 = vmatpush.msra.mxu2 %v168_v25 }
  0x2b   :  { %149 = vmatpush.msra.mxu1 %v124_v12 }
  0x2c   :  { %188 = vmatpush.msra.mxu2 %v167_v26 }
  0x2d   :  { %150 = vmatpush.msra.mxu1 %v123_v13 }
  0x2e   :  { %189 = vmatpush.msra.mxu2 %v166_v27 }
  0x2f   :  { %151 = vmatpush.msra.mxu1 %v122_v14 }
  0x30   :  { %190 = vmatpush.msra.mxu2 %v165_v28 }
  0x31   :  { %152 = vmatpush.msra.mxu1 %v121_v15 }
  0x32   :  { %191 = vmatpush.msra.mxu2 %v164_v29 }
  0x33   :  { %153 = vmatpush.msra.mxu1 %v120_v16 }
  0x34   :  { %192 = vmatpush.msra.mxu2 %v163_v30 }
  0x35   :  { %154 = vmatpush.msra.mxu1 %v119_v17 }
  0x36   :  { %193 = vmatpush.msra.mxu2 %v162_v35 }
  0x38   :  { %194 = vmatpush.msra.mxu2 %v161_v36 }
  0x3a   :  { %195 = vmatpush.msra.mxu2 %v160_v37 }
  0x94   :  { %v115_v32 = vpop.f32.mrf.mxu0 }
  0x95   :  { %v116_v33 = vadd.f32 %v232_v31, %v115_v32 }
  0x97   :  { %v118_v34 = vmax.f32 %v116_v33, 0.0 }
  0x99   :  { %155 = vmatmul.f32.vlgmr.msra.gmra.mxu1 %v118_v34 }
 0x116   :  { %v156_v39 = vpop.f32.mrf.mxu1 }
 0x117   :  { %v157_v40 = vadd.f32 %v233_v38, %v156_v39 }
 0x119   :  { %v159_v41 = vmax.f32 %v157_v40, 0.0 }
 0x11b   :  { %196 = vmatmul.f32.vlgmr.msra.gmra.mxu2 %v159_v41 }
 0x19e   :  { %v197_v43 = vpop.f32.mrf.mxu2 }
 0x19f   :  { %v198_v44 = vadd.f32 %v234_v42, %v197_v43 }
 0x1a1   :  { %200 = vst [vmem:[#allocation10] sm:$0xff] %v198_v44 }
 0x1a2   :  { %204 = vsyncadd [#allocation4], 96  ;;  %s207_s28 = sshll.u32 %s449_s7, 4  ;;  %s371_s29 = smov [#allocation10]   ;;  %s208_s28 = int_to_ptr.hbm [resolvable:$true] %s207_s28 }
 0x1a3   :  { %s205_s30 = sshll.u32 %s371_s29, 4  ;;  %s206_s30 = int_to_ptr.vmem [resolvable:$true] %s205_s30 }
 0x1a4   :  { %213 = dma.vmem_to_hbm [thread:$0]  %s206_s30, 32, %s208_s28, [#allocation4], %s365_s11, %s365_s11, %s366_s12  }
 0x1a5   :  { %361 = dma.done.wait [#allocation4], 128  }
 0x1a6   :  { %362 = vsyncadd [#allocation4], 4294967168 }
 0x1a7   :  { %218 = vsyncpa [#allocation3], 1 }
 0x1a8   :  { %219 = vsyncpa [#allocation6], 1 }
 0x1a9   :  { %220 = vsyncpa [#allocation9], 1 }
 0x1aa   :  { %221 = vsyncpa [#allocation4], 1 }

</bundles_post_ra>
